<compile_context>
chip_gen: v6e
topology: v6e:2x2x1
jax: 0.10.0
libtpu: 0.0.40
codegen_flags: <defaults>
</compile_context>

<pallas_src>
import functools

import jax
import jax.numpy as jnp
from jax.experimental import pallas as pl
from jax.experimental.pallas import tpu as pltpu

BN_EPS = 1e-5
TILE_R_MAX = 512   # rows per tile (sublane dim), multiple of 8
LANES_MAX = 512    # lane-dense last dim, multiple of 128


def _fused_kernel(w_ref, g_ref, beta_ref, x_ref, o_ref,
                  acc_sum, acc_sq, scale_ref, offset_ref,
                  *, cout, rows_total, tile_r, lanes, inv_m):
    p = pl.program_id(0)   # phase: 0 = stats sweep, 1 = apply sweep
    i = pl.program_id(1)   # row-tile index

    # ------------------ phase 0: stats accumulation (VALU only) ------------------
    @pl.when(jnp.logical_and(p == 0, i == 0))
    def _init():
        acc_sum[...] = jnp.zeros_like(acc_sum)
        acc_sq[...] = jnp.zeros_like(acc_sq)

    @pl.when(p == 0)
    def _stats():
        x = x_ref[...]
        if rows_total % tile_r != 0:
            # Static branch: only emitted when the last tile overhangs the array.
            # Mask garbage rows so they contribute 0 to both sums.
            rows = i * tile_r + jax.lax.broadcasted_iota(jnp.int32, (tile_r, lanes), 0)
            x = jnp.where(rows < rows_total, x, 0.0)
        acc_sum[...] += x
        acc_sq[...] += x * x

    # ------- fold conv + BN into per-channel scale/offset (runs exactly once) ----
    @pl.when(jnp.logical_and(p == 1, i == 0))
    def _fold():
        s = jnp.sum(acc_sum[...], keepdims=True)      # (1, 1)
        sq = jnp.sum(acc_sq[...], keepdims=True)      # (1, 1)
        mean = s * inv_m
        # NOTE: E[x^2] - E[x]^2 in f32; the full-tile partial accumulators keep this
        # accurate for realistic M (many partial sums instead of one scalar).
        var = jnp.maximum(sq * inv_m - mean * mean, 0.0)
        for c in range(cout):                          # Cout is tiny & static
            w = w_ref[c]                               # SMEM scalars
            inv_std = jax.lax.rsqrt(w * w * var + BN_EPS)   # (1, 1), EUP
            sc = g_ref[c] * w * inv_std
            scale_ref[c] = sc
            offset_ref[c] = beta_ref[c] - sc * mean    # conv bias cancels exactly

    # ------------------ phase 1: out_c = scale_c * x + offset_c ------------------
    @pl.when(p == 1)
    def _apply():
        x = x_ref[...]
        for c in range(cout):
            o_ref[c, :, :] = scale_ref[c] * x + offset_ref[c]


@jax.jit
def conv1x1_bn(x_nchw, conv_w, conv_b, bn_gamma, bn_beta):
    """Forward of Conv2d(1, Cout, 1, bias=True) + BatchNorm2d(Cout) (batch stats)."""
    N, Cin, H, W = x_nchw.shape
    Cout = conv_w.shape[0]
    assert Cin == 1, "kernel is specialised for Conv2d(1, Cout, 1) as in the spec"
    # TODO(synk): general Cin > 1 path (per-tile channel matmul) not needed for this module.
    M = N * H * W
    del conv_b  # cancels exactly in the conv+BN fold (see header derivation)
    # TODO(synk): BatchNorm2d running_mean/running_var buffer updates are not produced
    # (only the forward output, which is all the reference module returns).

    # Lane-dense 2D view of x with NO data movement (plain reshape, Cin == 1 so the
    # NCHW flatten is already pixel order).
    if M % 128 == 0:
        lanes = 512 if M % 512 == 0 else (256 if M % 256 == 0 else 128)
        pad = 0
    elif M <= 8 * LANES_MAX:
        lanes = M            # tiny ragged input (e.g. the (1,1,2,2) test): one (1, M) block
        pad = 0
    else:
        # TODO(synk): large ragged M falls back to a zero-pad copy (zeros contribute 0 to
        # sum/sumsq and we divide by the true M); a flat-index mask would remove the copy.
        lanes = 128
        pad = (-M) % 128

    x_flat = x_nchw.reshape(M).astype(jnp.float32)
    if pad:
        x_flat = jnp.pad(x_flat, (0, pad))
    R = (M + pad) // lanes
    x2d = x_flat.reshape(R, lanes)

    tile_r = R if R <= TILE_R_MAX else TILE_R_MAX
    num_tiles = -(-R // tile_r)

    w = conv_w.reshape(Cout).astype(jnp.float32)
    g = bn_gamma.reshape(Cout).astype(jnp.float32)
    be = bn_beta.reshape(Cout).astype(jnp.float32)

    kernel = functools.partial(
        _fused_kernel, cout=Cout, rows_total=R, tile_r=tile_r, lanes=lanes,
        inv_m=1.0 / M)

    out3d = pl.pallas_call(
        kernel,
        out_shape=jax.ShapeDtypeStruct((Cout, R, lanes), jnp.float32),
        grid=(2, num_tiles),
        in_specs=[
            pl.BlockSpec(memory_space=pltpu.MemorySpace.SMEM),    # conv weight (Cout,)
            pl.BlockSpec(memory_space=pltpu.MemorySpace.SMEM),    # bn gamma    (Cout,)
            pl.BlockSpec(memory_space=pltpu.MemorySpace.SMEM),    # bn beta     (Cout,)
            pl.BlockSpec((tile_r, lanes), lambda p, i: (i, 0)),   # x tiles
        ],
        # Output stays resident on block 0 during the stats phase (index never changes
        # -> no garbage writebacks) and sweeps tiles during the apply phase.
        out_specs=pl.BlockSpec((Cout, tile_r, lanes), lambda p, i: (0, i * p, 0)),
        scratch_shapes=[
            pltpu.VMEM((tile_r, lanes), jnp.float32),   # sum(x)   partial accumulators
            pltpu.VMEM((tile_r, lanes), jnp.float32),   # sum(x^2) partial accumulators
            pltpu.VMEM((Cout, 1, 1), jnp.float32),      # folded scale_c
            pltpu.VMEM((Cout, 1, 1), jnp.float32),      # folded offset_c
        ],
        compiler_params=pltpu.CompilerParams(
            dimension_semantics=("arbitrary", "arbitrary"),
            vmem_limit_bytes=32 * 1024 * 1024,          # ~9 MiB used; safe on v5e/v6e/v7x
        ),
    )(w, g, be, x2d)

    out = out3d.reshape(Cout, R * lanes)
    if pad:
        out = out[:, :M]
    if N == 1:
        return out.reshape(1, Cout, H, W)               # free relabel when N == 1
    # TODO(synk): for N > 1, tile per image and write NCHW directly from the kernel
    # to avoid this transpose copy.
    return out.reshape(Cout, N, H, W).transpose(1, 0, 2, 3)


def _reference(x, conv_w, conv_b, bn_gamma, bn_beta):
    """Pure-JAX reference: conv1x1 + training-mode BatchNorm2d (batch stats)."""
    Cout = conv_w.shape[0]
    y = jnp.einsum("oc,nchw->nohw",
                   conv_w.reshape(Cout, -1).astype(jnp.float32),
                   x.astype(jnp.float32)) + conv_b.reshape(1, Cout, 1, 1)
    mean = jnp.mean(y, axis=(0, 2, 3), keepdims=True)
    var = jnp.mean(jnp.square(y - mean), axis=(0, 2, 3), keepdims=True)
    return (bn_gamma.reshape(1, Cout, 1, 1) * (y - mean) * jax.lax.rsqrt(var + BN_EPS)
            + bn_beta.reshape(1, Cout, 1, 1))


if __name__ == "__main__":
    key = jax.random.PRNGKey(0)
    k_x, k_w, k_b, k_x2, k_g2, k_b2 = jax.random.split(key, 6)

    # ---- the module's own test input: x3 = torch.randn(1, 1, 2, 2) ----------------
    x3 = jax.random.normal(k_x, (1, 1, 2, 2), dtype=jnp.float32)
    conv_w = jax.random.normal(k_w, (2, 1, 1, 1), dtype=jnp.float32)  # Conv2d(1, 2, 1)
    conv_b = jax.random.normal(k_b, (2,), dtype=jnp.float32)
    bn_gamma = jnp.ones((2,), dtype=jnp.float32)                       # BN defaults
    bn_beta = jnp.zeros((2,), dtype=jnp.float32)

    out = conv1x1_bn(x3, conv_w, conv_b, bn_gamma, bn_beta)
    jax.block_until_ready(out)
    ref = _reference(x3, conv_w, conv_b, bn_gamma, bn_beta)
    assert out.shape == (1, 2, 2, 2)
    assert jnp.allclose(out, ref, atol=1e-5, rtol=1e-5), "small-input mismatch"

    # ---- larger check: multi-tile grid + ragged last-tile masking (R=516, 2 tiles) --
    x_big = jax.random.normal(k_x2, (1, 1, 516, 512), dtype=jnp.float32)
    gamma_big = 1.0 + 0.1 * jax.random.normal(k_g2, (2,), dtype=jnp.float32)
    beta_big = jax.random.normal(k_b2, (2,), dtype=jnp.float32)
    out_big = conv1x1_bn(x_big, conv_w, conv_b, gamma_big, beta_big)
    jax.block_until_ready(out_big)
    ref_big = _reference(x_big, conv_w, conv_b, gamma_big, beta_big)
    assert out_big.shape == (1, 2, 516, 512)
    assert jnp.allclose(out_big, ref_big, atol=2e-3, rtol=2e-3), "large-input mismatch"

    print("KERNEL_OK")
</pallas_src>

<mosaic_0001>
module attributes {stable_mosaic.version = 11 : i64} {
  func.func @_fused_kernel(%arg0: i32, %arg1: i32, %arg2: memref<2xf32, #tpu.memory_space<smem>>, %arg3: memref<2xf32, #tpu.memory_space<smem>>, %arg4: memref<2xf32, #tpu.memory_space<smem>>, %arg5: memref<1x4xf32, #tpu.memory_space<vmem>>, %arg6: memref<2x1x4xf32, #tpu.memory_space<vmem>>, %arg7: memref<1x4xf32, #tpu.memory_space<vmem>>, %arg8: memref<1x4xf32, #tpu.memory_space<vmem>>, %arg9: memref<2x1x1xf32, #tpu.memory_space<vmem>>, %arg10: memref<2x1x1xf32, #tpu.memory_space<vmem>>) attributes {dimension_semantics = [#tpu.dimension_semantics<arbitrary>, #tpu.dimension_semantics<arbitrary>], iteration_bounds = array<i64: 2, 1>, scalar_prefetch = 0 : i64, scratch_operands = 4 : i64, tpu.core_type = #tpu.core_type<tc>, window_params = [{transform_indices = @transform_0, window_bounds = array<i64: 2>}, {transform_indices = @transform_1, window_bounds = array<i64: 2>}, {transform_indices = @transform_2, window_bounds = array<i64: 2>}, {transform_indices = @transform_3, window_bounds = array<i64: 1, 4>}, {transform_indices = @transform_4, window_bounds = array<i64: 2, 1, 4>}]} {
    %c0_i32 = arith.constant 0 : i32
    %0 = arith.cmpi eq, %arg0, %c0_i32 : i32
    %c0_i32_0 = arith.constant 0 : i32
    %1 = arith.cmpi eq, %arg1, %c0_i32_0 : i32
    %2 = arith.andi %0, %1 : i1
    %3 = arith.extui %2 : i1 to i32
    %c0_i32_1 = arith.constant 0 : i32
    %4 = arith.cmpi ne, %3, %c0_i32_1 : i32
    scf.if %4 {
      %cst = arith.constant 0.000000e+00 : f32
      %16 = vector.broadcast %cst : f32 to vector<1x4xf32>
      %c0 = arith.constant 0 : index
      %c0_8 = arith.constant 0 : index
      %17 = vector.load %arg7[%c0, %c0_8] : memref<1x4xf32, #tpu.memory_space<vmem>>, vector<1x4xf32>
      tpu.vector_store %arg7[%c0, %c0_8], %16 {strides = array<i32>} : memref<1x4xf32, #tpu.memory_space<vmem>>, vector<1x4xf32>,
      %cst_9 = arith.constant 0.000000e+00 : f32
      %18 = vector.broadcast %cst_9 : f32 to vector<1x4xf32>
      %c0_10 = arith.constant 0 : index
      %c0_11 = arith.constant 0 : index
      %19 = vector.load %arg8[%c0_10, %c0_11] : memref<1x4xf32, #tpu.memory_space<vmem>>, vector<1x4xf32>
      tpu.vector_store %arg8[%c0_10, %c0_11], %18 {strides = array<i32>} : memref<1x4xf32, #tpu.memory_space<vmem>>, vector<1x4xf32>,
    } else {
    }
    %c0_i32_2 = arith.constant 0 : i32
    %5 = arith.cmpi eq, %arg0, %c0_i32_2 : i32
    %6 = arith.extui %5 : i1 to i32
    %c0_i32_3 = arith.constant 0 : i32
    %7 = arith.cmpi ne, %6, %c0_i32_3 : i32
    scf.if %7 {
      %c0 = arith.constant 0 : index
      %c0_8 = arith.constant 0 : index
      %16 = vector.load %arg5[%c0, %c0_8] : memref<1x4xf32, #tpu.memory_space<vmem>>, vector<1x4xf32>
      %c0_9 = arith.constant 0 : index
      %c0_10 = arith.constant 0 : index
      %17 = vector.load %arg7[%c0_9, %c0_10] : memref<1x4xf32, #tpu.memory_space<vmem>>, vector<1x4xf32>
      %18 = arith.addf %17, %16 : vector<1x4xf32>
      %c0_11 = arith.constant 0 : index
      %c0_12 = arith.constant 0 : index
      %19 = vector.load %arg7[%c0_11, %c0_12] : memref<1x4xf32, #tpu.memory_space<vmem>>, vector<1x4xf32>
      tpu.vector_store %arg7[%c0_11, %c0_12], %18 {strides = array<i32>} : memref<1x4xf32, #tpu.memory_space<vmem>>, vector<1x4xf32>,
      %c0_13 = arith.constant 0 : index
      %c0_14 = arith.constant 0 : index
      %20 = vector.load %arg8[%c0_13, %c0_14] : memref<1x4xf32, #tpu.memory_space<vmem>>, vector<1x4xf32>
      %21 = arith.mulf %16, %16 : vector<1x4xf32>
      %22 = arith.addf %20, %21 : vector<1x4xf32>
      %c0_15 = arith.constant 0 : index
      %c0_16 = arith.constant 0 : index
      %23 = vector.load %arg8[%c0_15, %c0_16] : memref<1x4xf32, #tpu.memory_space<vmem>>, vector<1x4xf32>
      tpu.vector_store %arg8[%c0_15, %c0_16], %22 {strides = array<i32>} : memref<1x4xf32, #tpu.memory_space<vmem>>, vector<1x4xf32>,
    } else {
    }
    %c1_i32 = arith.constant 1 : i32
    %8 = arith.cmpi eq, %arg0, %c1_i32 : i32
    %c0_i32_4 = arith.constant 0 : i32
    %9 = arith.cmpi eq, %arg1, %c0_i32_4 : i32
    %10 = arith.andi %8, %9 : i1
    %11 = arith.extui %10 : i1 to i32
    %c0_i32_5 = arith.constant 0 : i32
    %12 = arith.cmpi ne, %11, %c0_i32_5 : i32
    scf.if %12 {
      %c0 = arith.constant 0 : index
      %c0_8 = arith.constant 0 : index
      %16 = vector.load %arg7[%c0, %c0_8] : memref<1x4xf32, #tpu.memory_space<vmem>>, vector<1x4xf32>
      %17 = vector.shape_cast %16 : vector<1x4xf32> to vector<1x1x4xf32>
      %cst = arith.constant dense<0.000000e+00> : vector<1xf32>
      %18 = vector.multi_reduction <add>, %17, %cst [1, 2] : vector<1x1x4xf32> to vector<1xf32>
      %19 = vector.shape_cast %18 : vector<1xf32> to vector<1x1x1xf32>
      %20 = vector.extract %19[0, 0, 0] : f32 from vector<1x1x1xf32>
      %21 = vector.broadcast %20 : f32 to vector<1x1xf32>
      %c0_9 = arith.constant 0 : index
      %c0_10 = arith.constant 0 : index
      %22 = vector.load %arg8[%c0_9, %c0_10] : memref<1x4xf32, #tpu.memory_space<vmem>>, vector<1x4xf32>
      %23 = vector.shape_cast %22 : vector<1x4xf32> to vector<1x1x4xf32>
      %cst_11 = arith.constant dense<0.000000e+00> : vector<1xf32>
      %24 = vector.multi_reduction <add>, %23, %cst_11 [1, 2] : vector<1x1x4xf32> to vector<1xf32>
      %25 = vector.shape_cast %24 : vector<1xf32> to vector<1x1x1xf32>
      %26 = vector.extract %25[0, 0, 0] : f32 from vector<1x1x1xf32>
      %27 = vector.broadcast %26 : f32 to vector<1x1xf32>
      %cst_12 = arith.constant 2.500000e-01 : f32
      %28 = vector.broadcast %cst_12 : f32 to vector<1x1xf32>
      %29 = arith.mulf %21, %28 : vector<1x1xf32>
      %cst_13 = arith.constant 2.500000e-01 : f32
      %30 = vector.broadcast %cst_13 : f32 to vector<1x1xf32>
      %31 = arith.mulf %27, %30 : vector<1x1xf32>
      %32 = arith.mulf %29, %29 : vector<1x1xf32>
      %33 = arith.subf %31, %32 : vector<1x1xf32>
      %cst_14 = arith.constant 0.000000e+00 : f32
      %34 = vector.broadcast %cst_14 : f32 to vector<1x1xf32>
      %35 = arith.maximumf %33, %34 : vector<1x1xf32>
      %c0_15 = arith.constant 0 : index
      %36 = memref.load %arg2[%c0_15] : memref<2xf32, #tpu.memory_space<smem>>
      %37 = arith.mulf %36, %36 : f32
      %38 = vector.broadcast %37 : f32 to vector<1x1xf32>
      %39 = arith.mulf %38, %35 : vector<1x1xf32>
      %cst_16 = arith.constant 9.99999974E-6 : f32
      %40 = vector.broadcast %cst_16 : f32 to vector<1x1xf32>
      %41 = arith.addf %39, %40 : vector<1x1xf32>
      %42 = math.rsqrt %41 : vector<1x1xf32>
      %c0_17 = arith.constant 0 : index
      %43 = memref.load %arg3[%c0_17] : memref<2xf32, #tpu.memory_space<smem>>
      %44 = arith.mulf %43, %36 : f32
      %45 = vector.broadcast %44 : f32 to vector<1x1xf32>
      %46 = arith.mulf %45, %42 : vector<1x1xf32>
      %c0_18 = arith.constant 0 : index
      %c0_19 = arith.constant 0 : index
      %c0_20 = arith.constant 0 : index
      %47 = vector.load %arg9[%c0_18, %c0_19, %c0_20] : memref<2x1x1xf32, #tpu.memory_space<vmem>>, vector<1x1x1xf32>
      %48 = vector.shape_cast %47 : vector<1x1x1xf32> to vector<1x1xf32>
      %49 = vector.shape_cast %46 : vector<1x1xf32> to vector<1x1x1xf32>
      tpu.vector_store %arg9[%c0_18, %c0_19, %c0_20], %49 {strides = array<i32>} : memref<2x1x1xf32, #tpu.memory_space<vmem>>, vector<1x1x1xf32>,
      %c0_21 = arith.constant 0 : index
      %50 = memref.load %arg4[%c0_21] : memref<2xf32, #tpu.memory_space<smem>>
      %51 = arith.mulf %46, %29 : vector<1x1xf32>
      %52 = vector.broadcast %50 : f32 to vector<1x1xf32>
      %53 = arith.subf %52, %51 : vector<1x1xf32>
      %c0_22 = arith.constant 0 : index
      %c0_23 = arith.constant 0 : index
      %c0_24 = arith.constant 0 : index
      %54 = vector.load %arg10[%c0_22, %c0_23, %c0_24] : memref<2x1x1xf32, #tpu.memory_space<vmem>>, vector<1x1x1xf32>
      %55 = vector.shape_cast %54 : vector<1x1x1xf32> to vector<1x1xf32>
      %56 = vector.shape_cast %53 : vector<1x1xf32> to vector<1x1x1xf32>
      tpu.vector_store %arg10[%c0_22, %c0_23, %c0_24], %56 {strides = array<i32>} : memref<2x1x1xf32, #tpu.memory_space<vmem>>, vector<1x1x1xf32>,
      %c1 = arith.constant 1 : index
      %57 = memref.load %arg2[%c1] : memref<2xf32, #tpu.memory_space<smem>>
      %58 = arith.mulf %57, %57 : f32
      %59 = vector.broadcast %58 : f32 to vector<1x1xf32>
      %60 = arith.mulf %59, %35 : vector<1x1xf32>
      %cst_25 = arith.constant 9.99999974E-6 : f32
      %61 = vector.broadcast %cst_25 : f32 to vector<1x1xf32>
      %62 = arith.addf %60, %61 : vector<1x1xf32>
      %63 = math.rsqrt %62 : vector<1x1xf32>
      %c1_26 = arith.constant 1 : index
      %64 = memref.load %arg3[%c1_26] : memref<2xf32, #tpu.memory_space<smem>>
      %65 = arith.mulf %64, %57 : f32
      %66 = vector.broadcast %65 : f32 to vector<1x1xf32>
      %67 = arith.mulf %66, %63 : vector<1x1xf32>
      %c1_27 = arith.constant 1 : index
      %c0_28 = arith.constant 0 : index
      %c0_29 = arith.constant 0 : index
      %68 = vector.load %arg9[%c1_27, %c0_28, %c0_29] : memref<2x1x1xf32, #tpu.memory_space<vmem>>, vector<1x1x1xf32>
      %69 = vector.shape_cast %68 : vector<1x1x1xf32> to vector<1x1xf32>
      %70 = vector.shape_cast %67 : vector<1x1xf32> to vector<1x1x1xf32>
      tpu.vector_store %arg9[%c1_27, %c0_28, %c0_29], %70 {strides = array<i32>} : memref<2x1x1xf32, #tpu.memory_space<vmem>>, vector<1x1x1xf32>,
      %c1_30 = arith.constant 1 : index
      %71 = memref.load %arg4[%c1_30] : memref<2xf32, #tpu.memory_space<smem>>
      %72 = arith.mulf %67, %29 : vector<1x1xf32>
      %73 = vector.broadcast %71 : f32 to vector<1x1xf32>
      %74 = arith.subf %73, %72 : vector<1x1xf32>
      %c1_31 = arith.constant 1 : index
      %c0_32 = arith.constant 0 : index
      %c0_33 = arith.constant 0 : index
      %75 = vector.load %arg10[%c1_31, %c0_32, %c0_33] : memref<2x1x1xf32, #tpu.memory_space<vmem>>, vector<1x1x1xf32>
      %76 = vector.shape_cast %75 : vector<1x1x1xf32> to vector<1x1xf32>
      %77 = vector.shape_cast %74 : vector<1x1xf32> to vector<1x1x1xf32>
      tpu.vector_store %arg10[%c1_31, %c0_32, %c0_33], %77 {strides = array<i32>} : memref<2x1x1xf32, #tpu.memory_space<vmem>>, vector<1x1x1xf32>,
    } else {
    }
    %c1_i32_6 = arith.constant 1 : i32
    %13 = arith.cmpi eq, %arg0, %c1_i32_6 : i32
    %14 = arith.extui %13 : i1 to i32
    %c0_i32_7 = arith.constant 0 : i32
    %15 = arith.cmpi ne, %14, %c0_i32_7 : i32
    scf.if %15 {
      %c0 = arith.constant 0 : index
      %c0_8 = arith.constant 0 : index
      %16 = vector.load %arg5[%c0, %c0_8] : memref<1x4xf32, #tpu.memory_space<vmem>>, vector<1x4xf32>
      %c0_9 = arith.constant 0 : index
      %c0_10 = arith.constant 0 : index
      %c0_11 = arith.constant 0 : index
      %17 = vector.load %arg9[%c0_9, %c0_10, %c0_11] : memref<2x1x1xf32, #tpu.memory_space<vmem>>, vector<1x1x1xf32>
      %18 = vector.shape_cast %17 : vector<1x1x1xf32> to vector<1x1xf32>
      %19 = vector.broadcast %18 : vector<1x1xf32> to vector<1x4xf32>
      %20 = arith.mulf %19, %16 : vector<1x4xf32>
      %c0_12 = arith.constant 0 : index
      %c0_13 = arith.constant 0 : index
      %c0_14 = arith.constant 0 : index
      %21 = vector.load %arg10[%c0_12, %c0_13, %c0_14] : memref<2x1x1xf32, #tpu.memory_space<vmem>>, vector<1x1x1xf32>
      %22 = vector.shape_cast %21 : vector<1x1x1xf32> to vector<1x1xf32>
      %23 = vector.broadcast %22 : vector<1x1xf32> to vector<1x4xf32>
      %24 = arith.addf %20, %23 : vector<1x4xf32>
      %c0_15 = arith.constant 0 : index
      %c0_16 = arith.constant 0 : index
      %c0_17 = arith.constant 0 : index
      %25 = vector.load %arg6[%c0_15, %c0_16, %c0_17] : memref<2x1x4xf32, #tpu.memory_space<vmem>>, vector<1x1x4xf32>
      %26 = vector.shape_cast %25 : vector<1x1x4xf32> to vector<1x4xf32>
      %27 = vector.shape_cast %24 : vector<1x4xf32> to vector<1x1x4xf32>
      tpu.vector_store %arg6[%c0_15, %c0_16, %c0_17], %27 {strides = array<i32>} : memref<2x1x4xf32, #tpu.memory_space<vmem>>, vector<1x1x4xf32>,
      %c1 = arith.constant 1 : index
      %c0_18 = arith.constant 0 : index
      %c0_19 = arith.constant 0 : index
      %28 = vector.load %arg9[%c1, %c0_18, %c0_19] : memref<2x1x1xf32, #tpu.memory_space<vmem>>, vector<1x1x1xf32>
      %29 = vector.shape_cast %28 : vector<1x1x1xf32> to vector<1x1xf32>
      %30 = vector.broadcast %29 : vector<1x1xf32> to vector<1x4xf32>
      %31 = arith.mulf %30, %16 : vector<1x4xf32>
      %c1_20 = arith.constant 1 : index
      %c0_21 = arith.constant 0 : index
      %c0_22 = arith.constant 0 : index
      %32 = vector.load %arg10[%c1_20, %c0_21, %c0_22] : memref<2x1x1xf32, #tpu.memory_space<vmem>>, vector<1x1x1xf32>
      %33 = vector.shape_cast %32 : vector<1x1x1xf32> to vector<1x1xf32>
      %34 = vector.broadcast %33 : vector<1x1xf32> to vector<1x4xf32>
      %35 = arith.addf %31, %34 : vector<1x4xf32>
      %c1_23 = arith.constant 1 : index
      %c0_24 = arith.constant 0 : index
      %c0_25 = arith.constant 0 : index
      %36 = vector.load %arg6[%c1_23, %c0_24, %c0_25] : memref<2x1x4xf32, #tpu.memory_space<vmem>>, vector<1x1x4xf32>
      %37 = vector.shape_cast %36 : vector<1x1x4xf32> to vector<1x4xf32>
      %38 = vector.shape_cast %35 : vector<1x4xf32> to vector<1x1x4xf32>
      tpu.vector_store %arg6[%c1_23, %c0_24, %c0_25], %38 {strides = array<i32>} : memref<2x1x4xf32, #tpu.memory_space<vmem>>, vector<1x1x4xf32>,
    } else {
    }
    return
  }
  func.func @transform_0(%arg0: i32, %arg1: i32) -> i32 {
    %c0_i32 = arith.constant 0 : i32
    %c0_i32_0 = arith.constant 0 : i32
    return %c0_i32 : i32
  }
  func.func @transform_1(%arg0: i32, %arg1: i32) -> i32 {
    %c0_i32 = arith.constant 0 : i32
    %c0_i32_0 = arith.constant 0 : i32
    return %c0_i32 : i32
  }
  func.func @transform_2(%arg0: i32, %arg1: i32) -> i32 {
    %c0_i32 = arith.constant 0 : i32
    %c0_i32_0 = arith.constant 0 : i32
    return %c0_i32 : i32
  }
  func.func @transform_3(%arg0: i32, %arg1: i32) -> (i32, i32) {
    %c0_i32 = arith.constant 0 : i32
    %c0_i32_0 = arith.constant 0 : i32
    return %arg1, %c0_i32 : i32, i32
  }
  func.func @transform_4(%arg0: i32, %arg1: i32) -> (i32, i32, i32) {
    %0 = arith.muli %arg1, %arg0 : i32
    %c0_i32 = arith.constant 0 : i32
    %c0_i32_0 = arith.constant 0 : i32
    %c0_i32_1 = arith.constant 0 : i32
    return %c0_i32, %0, %c0_i32_0 : i32, i32, i32
  }
}

</mosaic_0001>

<bundles_post_ra>
// kernel: conv1x1_bn.1
= control target key start
LH: loop header
LB: loop body
LE: loop exit
PB: predicated region body
PF: predicated region fallthrough
CT: control target
= control target key end

     0   :  { %9 = vsyncpa [#allocation7], 0  ;;  %s782_s0 = inlined_call_operand.vmem [shape: f32[2], index: 0, kind: input, shape index: {}]   ;;  %s783_s1 = inlined_call_operand.vmem [shape: f32[2], index: 1, kind: input, shape index: {}]   ;;  %s784_s2 = inlined_call_operand.vmem [shape: f32[2], index: 2, kind: input, shape index: {}]   ;;  %s785_s3 = inlined_call_operand.vmem [shape: f32[1,4], index: 3, kind: input, shape index: {}]   ;;  %s786_s4 = inlined_call_operand.vmem [shape: f32[2,1,4], index: 4, kind: output, shape index: {}]  }
   0x1   :  { %10 = vsyncpa [#allocation9], 0  ;;  %s678_s15 = smov 0   ;;  %s680_s16 = smov 0  }
   0x2   :  { %s682_s17 = smov 0  }
   0x3 LB: > { %s174_s20 = sshll.u32 %s783_s1, 4  ;;  %s479_s21 = sadd.s32 4294967295, %s646_s17   ;;  %s646_s17 = sphi %s682_s17, %s16_s17   ;;  %s642_s16 = sphi %s680_s16, %s797_s16   ;;  %s638_s15 = sphi %s678_s15, %s796_s15   ;;  %s175_s20 = int_to_ptr.vmem [resolvable:$true] %s174_s20 }
   0x4   : > { %p481_p0 = scmp.ge.s32.totalorder %s646_s17, 1  ;;  %p150_p1 = scmp.lt.s32.totalorder %s646_s17, 3 }
   0x5   : > { %p699_p2 = scmp.eq.s32.totalorder %s479_s21, 0  ;;  %s28_s24 = sadd.s32 1, %s642_s16 }
   0x6   : > { %p703_p3 = pnand %p481_p0, %p150_p1  ;;  %s163_s27 = sshll.u32 %s782_s0, 4  ;;  %s164_s27 = int_to_ptr.vmem [resolvable:$true] %s163_s27 }
   0x7   : > { %s790_s22 = scalar_select %p699_p2, 1, 0 }
   0x8   : > { %s791_s23 = scalar_select %p703_p3, 1, 0 }
   0x9   : > { %p520_p4 = pneg %p703_p3  ;;  %p719_p6 = scmp.ge.s32.totalorder %s28_s24, 2 }
   0xa   : > { %s185_s6 = sshll.u32 %s784_s2, 4  ;;  %s571_s7 = scalar_lea.vmem %s175_s20, 16  ;;  %s186_s6 = int_to_ptr.vmem [resolvable:$true] %s185_s6 }
   0xb   : > { %p715_p5 = pnand %p699_p2, %p520_p4  ;;  %p572_p7 = scmp.ne.s32.totalorder %s175_s20, %s571_s7 }
   0xc   : > { %p579_p11 = scmp.lt.s32.totalorder %s175_s20, %s175_s20  ;;  %p580_p12 = scmp.lt.s32.totalorder %s571_s7, %s571_s7 }
   0xd   : > { %p573_p8 = pneg %p715_p5 }
   0xe   : > { %p581_p13 = por %p580_p12, %p579_p11 }
   0xf   : > { %p574_p9 = pnand %p573_p8, %p572_p7 }
  0x11   : > { %p575_p10 = pneg %p574_p9 }
  0x13   : > { %p582_p0 = pnand %p581_p13, %p575_p10 }
  0x15   : > { %585 = shalt.err (!%p582_p0)
}
  0x16   : > { %s648_s8 = smov [#allocation8]   ;;  %s799_s24 = smov (%p719_p6, %s28_s24), 0 }
  0x17   : > { %526 = dma.vmem_to_smem (!%p715_p5), %s175_s20, 16, %s648_s8, [#allocation9]  }
  0x18   : > { %s586_s9 = scalar_lea.vmem %s164_s27, 16  ;;  %p594_p9 = scmp.lt.s32.totalorder %s164_s27, %s164_s27 }
  0x19   : > { %p587_p1 = scmp.ne.s32.totalorder %s164_s27, %s586_s9  ;;  %p595_p2 = scmp.lt.s32.totalorder %s586_s9, %s586_s9 }
  0x1b   : > { %p589_p4 = pnand %p587_p1, %p573_p8  ;;  %p596_p11 = por %p595_p2, %p594_p9 }
  0x1d   : > { %p590_p7 = pneg %p589_p4 }
  0x1f   : > { %p597_p10 = pnand %p596_p11, %p590_p7 }
  0x21   : > { %600 = shalt.err (!%p597_p10)
}
  0x22   : > { %s649_s10 = smov [#allocation6]   ;;  %s601_s11 = scalar_lea.vmem %s186_s6, 16 }
  0x23   : > { %523 = dma.vmem_to_smem (!%p715_p5), %s164_s27, 16, %s649_s10, [#allocation7]  }
  0x24   : > { %p602_p6 = scmp.ne.s32.totalorder %s186_s6, %s601_s11  ;;  %p609_p0 = scmp.lt.s32.totalorder %s186_s6, %s186_s6 }
  0x25   : > { %p610_p1 = scmp.lt.s32.totalorder %s601_s11, %s601_s11 }
  0x26   : > { %p604_p12 = pnand %p602_p6, %p573_p8 }
  0x27   : > { %p611_p4 = por %p610_p1, %p609_p0 }
  0x28   : > { %p605_p13 = pneg %p604_p12 }
  0x2a   : > { %p612_p3 = pnand %p611_p4, %p605_p13 }
  0x2c   : > { %615 = shalt.err (!%p612_p3)
}
  0x2d   : > { %s650_s12 = smov [#allocation10]   ;;  %p794_p2 = scmp.ne.s32.totalorder %s791_s23, 0 }
  0x2e   : > { %529 = dma.vmem_to_smem (!%p715_p5), %s186_s6, 16, %s650_s12, [#allocation9]  }
  0x2f   : > { %204 = sbr.rel (%p794_p2) target bundleno = 465 (0x1d1), region = 36  ;;  %p795_p7 = scmp.ne.s32.totalorder (!%p794_p2), %s790_s22, 0 }
  0x34   : > { %629 = dma.done.wait (%p795_p7), [#allocation7], 16  }
  0x35   : > { %631 = vsyncadd (%p795_p7), [#allocation7], 4294967280 }
  0x36   : > { %633 = dma.done.wait (%p795_p7), [#allocation9], 32  }
  0x37   : > { %635 = vsyncadd (%p795_p7), [#allocation9], 4294967264 }
  0x38   : > { %218 = sfence }
  0x39   : > { %p244_p3 = scmp.eq.s32.totalorder %s638_s15, 0 }
  0x3a   : > { %vm250_vm0 = vcmask (%p244_p3), 24576   ;;  %v651_v0 = vmov (%p244_p3), 0.0  }
  0x3b   : > { %249 = sbr.rel (!%p244_p3) target bundleno = 64 (0x40), region = 52  ;;  %251 = vst.msk [vmem:[#allocation2] sm:$0x1] (%p244_p3), %vm250_vm0, %v651_v0  ;;  %252 = vst.msk [vmem:[#allocation3] sm:$0x1] (%p244_p3), %vm250_vm0, %v651_v0 }
  0x40 PF: > { %p491_p5 = scmp.ne.s32.totalorder %s638_s15, 0 }
  0x42   : > { %255 = sbr.rel (%p491_p5) target bundleno = 77 (0x4d), region = 56 }
  0x47   : > { %v256_v1 = vld [vmem:[%s785_s3] sm:$0x1]  ;;  %vm259_vm1 = vcmask 24576   ;;  %v261_v4 = vld [vmem:[#allocation3] sm:$0x1] }
  0x48   : > { %v257_v2 = vld [vmem:[#allocation2] sm:$0x1]  ;;  %v262_v5 = vmul.f32 %v256_v1, %v256_v1 }
  0x49   : > { %v258_v3 = vadd.f32 %v257_v2, %v256_v1 }
  0x4a   : > { %v263_v6 = vadd.f32 %v262_v5, %v261_v4 }
  0x4b   : > { %260 = vst.msk [vmem:[#allocation2] sm:$0x1] %vm259_vm1, %v258_v3 }
  0x4c   : > { %264 = vst.msk [vmem:[#allocation3] sm:$0x1] %vm259_vm1, %v263_v6 }
  0x4d PF: > { %p265_p8 = scmp.eq.s32.totalorder %s638_s15, 1 }
  0x4e   : > { %vm271_vm2 = vcmask (%p265_p8), 24576   ;;  %s300_s18 = sld [smem:[#allocation6]] (%p265_p8)  ;;  %vm310_vm3 = vcmask (%p265_p8), 0  }
  0x4f   : > { %269 = sbr.rel (!%p265_p8) target bundleno = 321 (0x141), region = 60  ;;  %s493_s19 = sld [smem:[#allocation6 + $0x1]] (%p265_p8) }
  0x50   : > { %s306_s25 = sld [smem:[#allocation8]] (%p265_p8) }
  0x51   : > { %s494_s26 = sld [smem:[#allocation8 + $0x1]] (%p265_p8) }
  0x52   : > { %v270_v7 = vld [vmem:[#allocation2] sm:$0x1] (%p265_p8)  ;;  %s312_s28 = sld [smem:[#allocation10]] (%p265_p8) }
  0x53   : > { %v283_v8 = vld [vmem:[#allocation3] sm:$0x1] (%p265_p8)  ;;  %v272_v9 = vsel (%p265_p8), %vm271_vm2, %v270_v7, 0.0  ;;  %s495_s30 = sld [smem:[#allocation10 + $0x1]] (%p265_p8) }
  0x54   : > { %273 = vadd.xlane.f32.xlu0 %v272_v9  ;;  %v284_v10 = vsel %vm271_vm2, %v283_v8, 0.0  ;;  %s301_s22 = smul.f32 %s300_s18, %s300_s18 }
  0x55   : > { %s318_s23 = smul.f32 %s493_s19, %s493_s19 }
  0x56   : > { %v302_v31 = vstv %s301_s22  ;;  %s307_s27 = smul.f32 %s306_s25, %s300_s18 }
  0x57   : > { %v319_v32 = vstv %s318_s23  ;;  %s324_s29 = smul.f32 %s494_s26, %s493_s19 }
  0x58   : > { %285 = vadd.xlane.f32.xlu0 %v284_v10  ;;  %v308_v38 = vstv %s307_s27  ;;  %v314_v43 = vstv %s312_s28 }
  0x59   : > { %v325_v39 = vstv %s324_s29  ;;  %v331_v46 = vstv %s495_s30 }
  0xdd   : > { %v274_v11 = vpop.xlane.xlu0 %273 }
  0xde   : > { %v275_v12 = vrot.slane %v274_v11, 4 }
  0xe0   : > { %v276_v13 = vadd.f32 %v275_v12, %v274_v11 }
  0xe1   : > { %v286_v14 = vpop.xlane.xlu0 %285 }
  0xe2   : > { %v277_v15 = vrot.slane %v276_v13, 2  ;;  %v287_v16 = vrot.slane %v286_v14, 4 }
  0xe4   : > { %v288_v17 = vadd.f32 %v287_v16, %v286_v14  ;;  %v278_v18 = vadd.f32 %v277_v15, %v276_v13 }
  0xe6   : > { %v289_v19 = vrot.slane %v288_v17, 2  ;;  %v279_v20 = vrot.slane %v278_v18, 1 }
  0xe8   : > { %v290_v21 = vadd.f32 %v289_v19, %v288_v17  ;;  %v280_v22 = vadd.f32 %v279_v20, %v278_v18 }
  0xea   : > { %504 = vpush %v280_v22  ;;  %v291_v23 = vrot.slane %v290_v21, 1 }
  0xec   : > { %v292_v24 = vadd.f32 %v291_v23, %v290_v21 }
  0xee   : > { %506 = vpush %v292_v24 }
 0x11b   : > { %s505_s20 = spop %504 }
 0x11c   : > { %v282_v25 = vstv %s505_s20 }
 0x11d   : > { %v295_v26 = vmul.f32 0.25, %v282_v25 }
 0x11f   : > { %s507_s21 = spop %506  ;;  %v297_v29 = vmul.f32 %v295_v26, %v295_v26 }
 0x120   : > { %v294_v27 = vstv %s507_s21 }
 0x121   : > { %v296_v28 = vmul.f32 0.25, %v294_v27 }
 0x123   : > { %v298_v30 = vsub.f32 %v296_v28, %v297_v29 }
 0x125   : > { %v299_v33 = vmax.f32 %v298_v30, 0.0 }
 0x127   : > { %v303_v34 = vmul.f32 %v302_v31, %v299_v33  ;;  %v320_v35 = vmul.f32 %v319_v32, %v299_v33 }
 0x129   : > { %v304_v36 = vadd.f32 1e-05, %v303_v34  ;;  %v321_v37 = vadd.f32 1e-05, %v320_v35 }
 0x12b   : > { %565 = vrsqrt.f32 %v304_v36 }
 0x12c   : > { %567 = vrsqrt.f32 %v321_v37 }
 0x138   : > { %v566_v40 = vpop.eup %565 }
 0x139   : > { %v568_v41 = vpop.eup %567  ;;  %v309_v42 = vmul.f32 %v566_v40, %v308_v38 }
 0x13a   : > { %v326_v44 = vmul.f32 %v568_v41, %v325_v39 }
 0x13b   : > { %311 = vst.msk [vmem:[#allocation4] sm:$0x1] %vm310_vm3, %v309_v42  ;;  %v313_v45 = vmul.f32 %v309_v42, %v295_v26 }
 0x13c   : > { %328 = vst.msk [vmem:[#allocation4 + $0x1] sm:$0x1] %vm310_vm3, %v326_v44  ;;  %v330_v47 = vmul.f32 %v326_v44, %v295_v26 }
 0x13d   : > { %v315_v48 = vsub.f32 %v314_v43, %v313_v45 }
 0x13e   : > { %v332_v49 = vsub.f32 %v331_v46, %v330_v47 }
 0x13f   : > { %316 = vst.msk [vmem:[#allocation5] sm:$0x1] %vm310_vm3, %v315_v48 }
 0x140   : > { %334 = vst.msk [vmem:[#allocation5 + $0x1] sm:$0x1] %vm310_vm3, %v332_v49 }
 0x141 PF: > { %p496_p9 = scmp.ne.s32.totalorder %s638_s15, 1 }
 0x143   : > { %337 = sbr.rel (%p496_p9) target bundleno = 465 (0x1d1), region = 64 }
 0x148   : > { %v350_v50 = vld [vmem:[#allocation5] sm:$0x1]  ;;  %v339_v51 = vld [vmem:[#allocation4] sm:$0x1]  ;;  %v652_v52 = vmov 0   ;;  %v345_v55 = vlaneseq  ;;  %vm361_vm4 = vcmask 24576  }
 0x149   : > { %570 = vset.pattern.permute.xlu1 %v652_v52  ;;  %569 = vset.pattern.permute.xlu0 %v652_v52  ;;  %v376_v53 = vld [vmem:[#allocation5 + $0x1] sm:$0x1]  ;;  %v364_v54 = vld [vmem:[#allocation4 + $0x1] sm:$0x1]  ;;  %v338_v60 = vld [vmem:[%s785_s3] sm:$0x1] }
 0x14a   : > { %353 = vperm.xlu1 %570, %v350_v50   ;;  %342 = vperm.xlu0 %569, %v339_v51   ;;  %v346_v56 = vshrl.u32 %v345_v55, 7 }
 0x14c   : > { %v347_v57 = vsub.s32 0, %v346_v56 }
 0x14e   : > { %379 = vperm.xlu1 %570, %v376_v53   ;;  %367 = vperm.xlu0 %569, %v364_v54  }
 0x1c5   : > { %v354_v58 = vpop.permute.xlu1 %353  ;;  %v343_v59 = vpop.permute.xlu0 %342 }
 0x1c6   : > { %v359_v61 = vrot.slane %v354_v58, %v347_v57  ;;  %v348_v62 = vrot.slane %v343_v59, %v347_v57 }
 0x1c8   : > { %v349_v63 = vmul.f32 %v348_v62, %v338_v60 }
 0x1c9   : > { %v380_v0 = vpop.permute.xlu1 %379  ;;  %v368_v1 = vpop.permute.xlu0 %367 }
 0x1ca   : > { %v360_v2 = vadd.f32 %v359_v61, %v349_v63  ;;  %v373_v3 = vrot.slane %v368_v1, %v347_v57  ;;  %v385_v4 = vrot.slane %v380_v0, %v347_v57 }
 0x1cc   : > { %362 = vst.msk [vmem:[%s786_s4] sm:$0x1] %vm361_vm4, %v360_v2  ;;  %v374_v5 = vmul.f32 %v373_v3, %v338_v60 }
 0x1ce   : > { %v386_v6 = vadd.f32 %v385_v4, %v374_v5 }
 0x1d0   : > { %497 = vst.msk [vmem:[%s786_s4 + $0x1] sm:$0x1] %vm361_vm4, %v386_v6 }
 0x1d1 PF: > { %s16_s17 = sadd.s32 1, %s646_s17   ;;  %s796_s15 = smov %s642_s16 }
 0x1d2   : > { %p13_p11 = scmp.ge.s32.totalorder %s16_s17, 4   ;;  %s797_s16 = smov %s799_s24 }
 0x1d4   :  { %15 = sbr.rel (!%p13_p11) target bundleno = 3 (0x3), region = 100 }
 0x1d9   :  { %409 = vsyncpa [#allocation7], 1 }
 0x1da   :  { %411 = vsyncpa [#allocation7 + $0x1], 1 }
 0x1db   :  { %412 = vsyncpa [#allocation9], 1 }

</bundles_post_ra>
